<compile_context>
chip_gen: v7x
topology: tpu7x:2x2x1
jax: 0.10.0
libtpu: 0.0.40
codegen_flags: <defaults>
</compile_context>

<pallas_src>
import functools

import jax
import jax.numpy as jnp
from jax.experimental import pallas as pl
from jax.experimental.pallas import tpu as pltpu


# ----------------------------------------------------------------------------
# Kernel: one batch tile through all four layers + log_softmax.
# x tile is bf16, weights bf16 (pre-transposed to (in, out)), biases f32 (1, out).
# Matmuls accumulate in f32 on the MXU; ReLU / log-softmax stay in f32.
# ----------------------------------------------------------------------------
def mlp_kernel(x_ref, w1_ref, b1_ref, w2_ref, b2_ref,
               w3_ref, b3_ref, w4_ref, b4_ref, o_ref):
    # fc1 + relu
    h = jnp.dot(x_ref[...], w1_ref[...],
                preferred_element_type=jnp.float32) + b1_ref[...]
    h = jnp.maximum(h, 0.0)
    # fc2 + relu
    h = jnp.dot(h.astype(jnp.bfloat16), w2_ref[...],
                preferred_element_type=jnp.float32) + b2_ref[...]
    h = jnp.maximum(h, 0.0)
    # fc3 + relu
    h = jnp.dot(h.astype(jnp.bfloat16), w3_ref[...],
                preferred_element_type=jnp.float32) + b3_ref[...]
    h = jnp.maximum(h, 0.0)
    # fc4 (logits)
    logits = jnp.dot(h.astype(jnp.bfloat16), w4_ref[...],
                     preferred_element_type=jnp.float32) + b4_ref[...]
    # log_softmax along the class axis, numerically stable, f32.
    m = jnp.max(logits, axis=-1, keepdims=True)
    shifted = logits - m
    lse = jnp.log(jnp.sum(jnp.exp(shifted), axis=-1, keepdims=True))
    o_ref[...] = shifted - lse


def _round_up(n, m):
    return (n + m - 1) // m * m


def prepare_params(params):
    """One-time glue (hoisted out of the hot path): transpose PyTorch-convention
    (out, in) weights to (in, out) bf16, reshape biases to f32 (1, out)."""
    prep = {}
    for i in range(1, 5):
        prep[f"w{i}"] = jnp.asarray(params[f"w{i}"]).T.astype(jnp.bfloat16)
        prep[f"b{i}"] = jnp.asarray(params[f"b{i}"]).reshape(1, -1).astype(jnp.float32)
    return prep


def net_forward(x, prep, *, block_b=512):
    """x: (B, 784) float. prep: output of prepare_params. Returns (B, 10) f32 log-probs."""
    B, K = x.shape
    assert K == 28 * 28

    # Batch tile: multiple of 16 (bf16 sublane packing); large tiles amortize
    # per-step overhead (block_b=512 default; v6e can use 1024-2048).
    tb = min(block_b, _round_up(B, 16))
    Bp = _round_up(B, tb)

    xb = x.astype(jnp.bfloat16)
    if Bp != B:
        xb = jnp.pad(xb, ((0, Bp - B), (0, 0)))

    w1, b1 = prep["w1"], prep["b1"]
    w2, b2 = prep["w2"], prep["b2"]
    w3, b3 = prep["w3"], prep["b3"]
    w4, b4 = prep["w4"], prep["b4"]

    def const_spec(arr):
        # Weights/biases: same (0, 0) block every grid step -> stay VMEM-resident.
        return pl.BlockSpec(arr.shape, lambda i: (0,) * arr.ndim)

    param_args = (w1, b1, w2, b2, w3, b3, w4, b4)
    param_bytes = sum(int(a.size) * a.dtype.itemsize for a in param_args)
    flops = 2 * Bp * (784 * 64 + 64 * 64 + 64 * 64 + 64 * 10)
    bytes_accessed = Bp * 784 * 2 + Bp * 10 * 4 + param_bytes
    transcendentals = Bp * 11  # 10 exp + 1 log per row

    out = pl.pallas_call(
        mlp_kernel,
        out_shape=jax.ShapeDtypeStruct((Bp, 10), jnp.float32),
        grid=(Bp // tb,),
        in_specs=[pl.BlockSpec((tb, K), lambda i: (i, 0))]
                 + [const_spec(a) for a in param_args],
        out_specs=pl.BlockSpec((tb, 10), lambda i: (i, 0)),
        compiler_params=pltpu.CompilerParams(
            dimension_semantics=("parallel",),   # shard batch tiles across v7x's 2 TCs
            vmem_limit_bytes=16 << 20,           # right-sized: ~2 MiB actual footprint
        ),
        cost_estimate=pl.CostEstimate(
            flops=flops,
            transcendentals=transcendentals,
            bytes_accessed=bytes_accessed,
        ),
    )(xb, *param_args)

    return out[:B] if Bp != B else out


# ----------------------------------------------------------------------------
# Reference + init
# ----------------------------------------------------------------------------
def init_params(key):
    """Deterministic init mimicking nn.Linear default (uniform +/- 1/sqrt(fan_in))."""
    dims = [(64, 784), (64, 64), (64, 64), (10, 64)]
    params = {}
    for i, (out_f, in_f) in enumerate(dims, start=1):
        key, kw, kb = jax.random.split(key, 3)
        bound = 1.0 / (in_f ** 0.5)
        params[f"w{i}"] = jax.random.uniform(kw, (out_f, in_f), jnp.float32, -bound, bound)
        params[f"b{i}"] = jax.random.uniform(kb, (out_f,), jnp.float32, -bound, bound)
    return params


def reference_forward_bf16(x, prep):
    """Mirrors the kernel's mixed precision (bf16 operands, f32 accumulate)."""
    h = x.astype(jnp.bfloat16)
    for i in (1, 2, 3):
        h = jnp.maximum(
            jnp.dot(h, prep[f"w{i}"], preferred_element_type=jnp.float32) + prep[f"b{i}"],
            0.0).astype(jnp.bfloat16)
    logits = jnp.dot(h, prep["w4"], preferred_element_type=jnp.float32) + prep["b4"]
    return jax.nn.log_softmax(logits, axis=1)


def reference_forward_f32(x, params):
    h = x
    for i in (1, 2, 3):
        h = jnp.maximum(h @ params[f"w{i}"].T + params[f"b{i}"], 0.0)
    logits = h @ params["w4"].T + params["b4"]
    return jax.nn.log_softmax(logits, axis=1)


if __name__ == "__main__":
    key = jax.random.PRNGKey(0)
    key, kx = jax.random.split(key)
    B = 8
    x = jax.random.normal(kx, (B, 28 * 28), jnp.float32)
    params = init_params(key)

    prep = prepare_params(params)  # one-time: transposes hoisted out of the hot path
    forward = jax.jit(functools.partial(net_forward, block_b=512))

    out = forward(x, prep)
    jax.block_until_ready(out)

    ref_bf16 = reference_forward_bf16(x, prep)
    ref_f32 = reference_forward_f32(x, params)

    assert out.shape == (B, 10)
    # Tight check vs a reference using the same bf16 operand / f32 accumulate recipe.
    assert jnp.allclose(out, ref_bf16, atol=2e-3, rtol=2e-3), "mismatch vs bf16 reference"
    # Loose sanity check vs the pure-f32 PyTorch-equivalent math.
    assert jnp.allclose(out, ref_f32, atol=5e-2, rtol=5e-2), "mismatch vs f32 reference"
    print("KERNEL_OK")
</pallas_src>

<mosaic_0001>
module attributes {stable_mosaic.version = 11 : i64} {
  func.func @mlp_kernel(%arg0: i32, %arg1: memref<16x784xbf16, #tpu.memory_space<vmem>>, %arg2: memref<784x64xbf16, #tpu.memory_space<vmem>>, %arg3: memref<1x64xf32, #tpu.memory_space<vmem>>, %arg4: memref<64x64xbf16, #tpu.memory_space<vmem>>, %arg5: memref<1x64xf32, #tpu.memory_space<vmem>>, %arg6: memref<64x64xbf16, #tpu.memory_space<vmem>>, %arg7: memref<1x64xf32, #tpu.memory_space<vmem>>, %arg8: memref<64x10xbf16, #tpu.memory_space<vmem>>, %arg9: memref<1x10xf32, #tpu.memory_space<vmem>>, %arg10: memref<16x10xf32, #tpu.memory_space<vmem>>) attributes {dimension_semantics = [#tpu.dimension_semantics<parallel>], iteration_bounds = array<i64: 1>, scalar_prefetch = 0 : i64, scratch_operands = 0 : i64, tpu.core_type = #tpu.core_type<tc>, window_params = [{transform_indices = @transform_0, window_bounds = array<i64: 16, 784>}, {pipeline_mode = #tpu.pipeline_mode<synchronous>, transform_indices = @transform_1, window_bounds = array<i64: 784, 64>}, {pipeline_mode = #tpu.pipeline_mode<synchronous>, transform_indices = @transform_2, window_bounds = array<i64: 1, 64>}, {pipeline_mode = #tpu.pipeline_mode<synchronous>, transform_indices = @transform_3, window_bounds = array<i64: 64, 64>}, {pipeline_mode = #tpu.pipeline_mode<synchronous>, transform_indices = @transform_4, window_bounds = array<i64: 1, 64>}, {pipeline_mode = #tpu.pipeline_mode<synchronous>, transform_indices = @transform_5, window_bounds = array<i64: 64, 64>}, {pipeline_mode = #tpu.pipeline_mode<synchronous>, transform_indices = @transform_6, window_bounds = array<i64: 1, 64>}, {pipeline_mode = #tpu.pipeline_mode<synchronous>, transform_indices = @transform_7, window_bounds = array<i64: 64, 10>}, {pipeline_mode = #tpu.pipeline_mode<synchronous>, transform_indices = @transform_8, window_bounds = array<i64: 1, 10>}, {transform_indices = @transform_9, window_bounds = array<i64: 16, 10>}]} {
    %c0 = arith.constant 0 : index
    %c0_0 = arith.constant 0 : index
    %0 = vector.load %arg1[%c0, %c0_0] : memref<16x784xbf16, #tpu.memory_space<vmem>>, vector<16x784xbf16>
    %c0_1 = arith.constant 0 : index
    %c0_2 = arith.constant 0 : index
    %1 = vector.load %arg2[%c0_1, %c0_2] : memref<784x64xbf16, #tpu.memory_space<vmem>>, vector<784x64xbf16>
    %cst = arith.constant dense<0.000000e+00> : vector<16x64xf32>
    %2 = tpu.matmul %0, %1, %cst {dimension_numbers = #tpu.dot_dimension_numbers<[1], [0], [0], [1], [0, 0, 1, 1], [], []>} : vector<16x784xbf16>, vector<784x64xbf16>, vector<16x64xf32> -> vector<16x64xf32>
    %c0_3 = arith.constant 0 : index
    %c0_4 = arith.constant 0 : index
    %3 = vector.load %arg3[%c0_3, %c0_4] : memref<1x64xf32, #tpu.memory_space<vmem>>, vector<1x64xf32>
    %4 = vector.broadcast %3 : vector<1x64xf32> to vector<16x64xf32>
    %5 = arith.addf %2, %4 : vector<16x64xf32>
    %cst_5 = arith.constant 0.000000e+00 : f32
    %6 = vector.broadcast %cst_5 : f32 to vector<16x64xf32>
    %7 = arith.maximumf %5, %6 : vector<16x64xf32>
    %8 = arith.truncf %7 : vector<16x64xf32> to vector<16x64xbf16>
    %c0_6 = arith.constant 0 : index
    %c0_7 = arith.constant 0 : index
    %9 = vector.load %arg4[%c0_6, %c0_7] : memref<64x64xbf16, #tpu.memory_space<vmem>>, vector<64x64xbf16>
    %cst_8 = arith.constant dense<0.000000e+00> : vector<16x64xf32>
    %10 = tpu.matmul %8, %9, %cst_8 {dimension_numbers = #tpu.dot_dimension_numbers<[1], [0], [0], [1], [0, 0, 1, 1], [], []>} : vector<16x64xbf16>, vector<64x64xbf16>, vector<16x64xf32> -> vector<16x64xf32>
    %c0_9 = arith.constant 0 : index
    %c0_10 = arith.constant 0 : index
    %11 = vector.load %arg5[%c0_9, %c0_10] : memref<1x64xf32, #tpu.memory_space<vmem>>, vector<1x64xf32>
    %12 = vector.broadcast %11 : vector<1x64xf32> to vector<16x64xf32>
    %13 = arith.addf %10, %12 : vector<16x64xf32>
    %cst_11 = arith.constant 0.000000e+00 : f32
    %14 = vector.broadcast %cst_11 : f32 to vector<16x64xf32>
    %15 = arith.maximumf %13, %14 : vector<16x64xf32>
    %16 = arith.truncf %15 : vector<16x64xf32> to vector<16x64xbf16>
    %c0_12 = arith.constant 0 : index
    %c0_13 = arith.constant 0 : index
    %17 = vector.load %arg6[%c0_12, %c0_13] : memref<64x64xbf16, #tpu.memory_space<vmem>>, vector<64x64xbf16>
    %cst_14 = arith.constant dense<0.000000e+00> : vector<16x64xf32>
    %18 = tpu.matmul %16, %17, %cst_14 {dimension_numbers = #tpu.dot_dimension_numbers<[1], [0], [0], [1], [0, 0, 1, 1], [], []>} : vector<16x64xbf16>, vector<64x64xbf16>, vector<16x64xf32> -> vector<16x64xf32>
    %c0_15 = arith.constant 0 : index
    %c0_16 = arith.constant 0 : index
    %19 = vector.load %arg7[%c0_15, %c0_16] : memref<1x64xf32, #tpu.memory_space<vmem>>, vector<1x64xf32>
    %20 = vector.broadcast %19 : vector<1x64xf32> to vector<16x64xf32>
    %21 = arith.addf %18, %20 : vector<16x64xf32>
    %cst_17 = arith.constant 0.000000e+00 : f32
    %22 = vector.broadcast %cst_17 : f32 to vector<16x64xf32>
    %23 = arith.maximumf %21, %22 : vector<16x64xf32>
    %24 = arith.truncf %23 : vector<16x64xf32> to vector<16x64xbf16>
    %c0_18 = arith.constant 0 : index
    %c0_19 = arith.constant 0 : index
    %25 = vector.load %arg8[%c0_18, %c0_19] : memref<64x10xbf16, #tpu.memory_space<vmem>>, vector<64x10xbf16>
    %cst_20 = arith.constant dense<0.000000e+00> : vector<16x10xf32>
    %26 = tpu.matmul %24, %25, %cst_20 {dimension_numbers = #tpu.dot_dimension_numbers<[1], [0], [0], [1], [0, 0, 1, 1], [], []>} : vector<16x64xbf16>, vector<64x10xbf16>, vector<16x10xf32> -> vector<16x10xf32>
    %c0_21 = arith.constant 0 : index
    %c0_22 = arith.constant 0 : index
    %27 = vector.load %arg9[%c0_21, %c0_22] : memref<1x10xf32, #tpu.memory_space<vmem>>, vector<1x10xf32>
    %28 = vector.broadcast %27 : vector<1x10xf32> to vector<16x10xf32>
    %29 = arith.addf %26, %28 : vector<16x10xf32>
    %cst_23 = arith.constant dense<0xFF800000> : vector<16xf32>
    %30 = vector.multi_reduction <maximumf>, %29, %cst_23 [1] : vector<16x10xf32> to vector<16xf32>
    %31 = vector.shape_cast %30 : vector<16xf32> to vector<16x1xf32>
    %32 = vector.broadcast %31 : vector<16x1xf32> to vector<16x10xf32>
    %33 = arith.subf %29, %32 : vector<16x10xf32>
    %34 = math.exp %33 : vector<16x10xf32>
    %cst_24 = arith.constant dense<0.000000e+00> : vector<16xf32>
    %35 = vector.multi_reduction <add>, %34, %cst_24 [1] : vector<16x10xf32> to vector<16xf32>
    %36 = vector.shape_cast %35 : vector<16xf32> to vector<16x1xf32>
    %37 = math.log %36 : vector<16x1xf32>
    %38 = vector.broadcast %37 : vector<16x1xf32> to vector<16x10xf32>
    %39 = arith.subf %33, %38 : vector<16x10xf32>
    %c0_25 = arith.constant 0 : index
    %c0_26 = arith.constant 0 : index
    %40 = vector.load %arg10[%c0_25, %c0_26] : memref<16x10xf32, #tpu.memory_space<vmem>>, vector<16x10xf32>
    tpu.vector_store %arg10[%c0_25, %c0_26], %39 {strides = array<i32>} : memref<16x10xf32, #tpu.memory_space<vmem>>, vector<16x10xf32>,
    return
  }
  func.func @transform_0(%arg0: i32) -> (i32, i32) {
    %c0_i32 = arith.constant 0 : i32
    %c0_i32_0 = arith.constant 0 : i32
    return %arg0, %c0_i32 : i32, i32
  }
  func.func @transform_1(%arg0: i32) -> (i32, i32) {
    %c0_i32 = arith.constant 0 : i32
    %c0_i32_0 = arith.constant 0 : i32
    %c0_i32_1 = arith.constant 0 : i32
    return %c0_i32, %c0_i32_0 : i32, i32
  }
  func.func @transform_2(%arg0: i32) -> (i32, i32) {
    %c0_i32 = arith.constant 0 : i32
    %c0_i32_0 = arith.constant 0 : i32
    %c0_i32_1 = arith.constant 0 : i32
    return %c0_i32, %c0_i32_0 : i32, i32
  }
  func.func @transform_3(%arg0: i32) -> (i32, i32) {
    %c0_i32 = arith.constant 0 : i32
    %c0_i32_0 = arith.constant 0 : i32
    %c0_i32_1 = arith.constant 0 : i32
    return %c0_i32, %c0_i32_0 : i32, i32
  }
  func.func @transform_4(%arg0: i32) -> (i32, i32) {
    %c0_i32 = arith.constant 0 : i32
    %c0_i32_0 = arith.constant 0 : i32
    %c0_i32_1 = arith.constant 0 : i32
    return %c0_i32, %c0_i32_0 : i32, i32
  }
  func.func @transform_5(%arg0: i32) -> (i32, i32) {
    %c0_i32 = arith.constant 0 : i32
    %c0_i32_0 = arith.constant 0 : i32
    %c0_i32_1 = arith.constant 0 : i32
    return %c0_i32, %c0_i32_0 : i32, i32
  }
  func.func @transform_6(%arg0: i32) -> (i32, i32) {
    %c0_i32 = arith.constant 0 : i32
    %c0_i32_0 = arith.constant 0 : i32
    %c0_i32_1 = arith.constant 0 : i32
    return %c0_i32, %c0_i32_0 : i32, i32
  }
  func.func @transform_7(%arg0: i32) -> (i32, i32) {
    %c0_i32 = arith.constant 0 : i32
    %c0_i32_0 = arith.constant 0 : i32
    %c0_i32_1 = arith.constant 0 : i32
    return %c0_i32, %c0_i32_0 : i32, i32
  }
  func.func @transform_8(%arg0: i32) -> (i32, i32) {
    %c0_i32 = arith.constant 0 : i32
    %c0_i32_0 = arith.constant 0 : i32
    %c0_i32_1 = arith.constant 0 : i32
    return %c0_i32, %c0_i32_0 : i32, i32
  }
  func.func @transform_9(%arg0: i32) -> (i32, i32) {
    %c0_i32 = arith.constant 0 : i32
    %c0_i32_0 = arith.constant 0 : i32
    return %arg0, %c0_i32 : i32, i32
  }
}

</mosaic_0001>

<bundles_post_ra>
// kernel: net_forward.1
= control target key start
LH: loop header
LB: loop body
LE: loop exit
PB: predicated region body
PF: predicated region fallthrough
CT: control target
= control target key end

     0   :  { %v1215_v38 = vmov 0.0   ;;  %vm1216_vm0 = vmmov 0   ;;  %vm475_vm1 = vcmask 130048   ;;  %vm685_vm2 = vcmask 523264   ;;  %s1519_s1 = inlined_call_operand.vmem [shape: bf16[784,64], index: 1, kind: input, shape index: {}]   ;;  %s1520_s0 = inlined_call_operand.vmem [shape: bf16[16,784], index: 0, kind: input, shape index: {}]   ;;  %s1521_s3 = inlined_call_operand.vmem [shape: bf16[64,64], index: 3, kind: input, shape index: {}]   ;;  %s1522_s5 = inlined_call_operand.vmem [shape: bf16[64,64], index: 5, kind: input, shape index: {}]   ;;  %s1523_s2 = inlined_call_operand.vmem [shape: f32[1,64], index: 2, kind: input, shape index: {}]   ;;  %s1524_s7 = inlined_call_operand.vmem [shape: bf16[64,10], index: 7, kind: input, shape index: {}]   ;;  %s1525_s4 = inlined_call_operand.vmem [shape: f32[1,64], index: 4, kind: input, shape index: {}]   ;;  %s1526_s6 = inlined_call_operand.vmem [shape: f32[1,64], index: 6, kind: input, shape index: {}]   ;;  %s1527_s8 = inlined_call_operand.vmem [shape: f32[1,10], index: 8, kind: input, shape index: {}]   ;;  %s1528_s9 = inlined_call_operand.vmem [shape: f32[16,10], index: 9, kind: output, shape index: {}]  }
   0x1   :  { %v1136_v0 = vld [vmem:[%s1519_s1 + $0x40] sm:$0xff]   ;;  %v1140_v4 = vld [vmem:[%s1519_s1 + $0x48] sm:$0xff]   ;;  %v1144_v8 = vld [vmem:[%s1519_s1 + $0x50] sm:$0xff]   ;;  %vm902_vm3 = vcmask 80896  }
   0x2   :  { %v1137_v1 = vld [vmem:[%s1519_s1] sm:$0xff]   ;;  %1009 = vmatprep.subr.bf16.mxu0 %v1136_v0  ;;  %v1141_v5 = vld [vmem:[%s1519_s1 + $0x8] sm:$0xff]   ;;  %v1145_v9 = vld [vmem:[%s1519_s1 + $0x10] sm:$0xff]  }
   0x3   :  { %v1138_v2 = vld [vmem:[%s1519_s1 + $0xc0] sm:$0xff]   ;;  %1010 = vmatpush3.bf16.msra.mxu0 %v1137_v1  ;;  %v1142_v6 = vld [vmem:[%s1519_s1 + $0xc8] sm:$0xff]   ;;  %v1146_v10 = vld [vmem:[%s1519_s1 + $0xd0] sm:$0xff]  }
   0x4   :  { %v1139_v3 = vld [vmem:[%s1519_s1 + $0x80] sm:$0xff]   ;;  %1031 = vmatprep.subr.bf16.mxu1 %v1138_v2  ;;  %1011 = vmatprep.subr.bf16.mxu0 %v1140_v4  ;;  %v1143_v7 = vld [vmem:[%s1519_s1 + $0x88] sm:$0xff]   ;;  %v1147_v11 = vld [vmem:[%s1519_s1 + $0x90] sm:$0xff]  }
   0x5   :  { %1032 = vmatpush3.bf16.msra.mxu1 %v1139_v3  ;;  %v1148_v12 = vld [vmem:[%s1519_s1 + $0x58] sm:$0xff]   ;;  %v1152_v16 = vld [vmem:[%s1519_s1 + $0x60] sm:$0xff]   ;;  %v1156_v20 = vld [vmem:[%s1519_s1 + $0x68] sm:$0xff]  }
   0x6   :  { %1033 = vmatprep.subr.bf16.mxu1 %v1142_v6  ;;  %v1149_v13 = vld [vmem:[%s1519_s1 + $0x18] sm:$0xff]   ;;  %v1153_v17 = vld [vmem:[%s1519_s1 + $0x20] sm:$0xff]   ;;  %v1157_v21 = vld [vmem:[%s1519_s1 + $0x28] sm:$0xff]  }
   0x7   :  { %1012 = vmatpush3.bf16.msra.mxu0 %v1141_v5  ;;  %v1150_v14 = vld [vmem:[%s1519_s1 + $0xd8] sm:$0xff]   ;;  %v1154_v18 = vld [vmem:[%s1519_s1 + $0xe0] sm:$0xff]   ;;  %v1158_v22 = vld [vmem:[%s1519_s1 + $0xe8] sm:$0xff]  }
   0x8   :  { %1013 = vmatprep.subr.bf16.mxu0 %v1144_v8  ;;  %v1151_v15 = vld [vmem:[%s1519_s1 + $0x98] sm:$0xff]   ;;  %v1155_v19 = vld [vmem:[%s1519_s1 + $0xa0] sm:$0xff]   ;;  %v1159_v23 = vld [vmem:[%s1519_s1 + $0xa8] sm:$0xff]  }
   0x9   :  { %1034 = vmatpush3.bf16.msra.mxu1 %v1143_v7  ;;  %v1160_v24 = vld [vmem:[%s1519_s1 + $0x70] sm:$0xff]   ;;  %v1164_v28 = vld [vmem:[%s1519_s1 + $0x78] sm:$0xff]   ;;  %v1169_v32 = vld [vmem:[%s1520_s0 + $0x4] ss:$28 sps:$4 sm:$0xff]  }
   0xa   :  { %1035 = vmatprep.subr.bf16.mxu1 %v1146_v10  ;;  %v1161_v25 = vld [vmem:[%s1519_s1 + $0x30] sm:$0xff]   ;;  %v1165_v29 = vld [vmem:[%s1519_s1 + $0x38] sm:$0xff]   ;;  %511 = vmatprep.mubr.bf16.mxu0 %v1169_v32  ;;  %v1171_v34 = vld [vmem:[%s1519_s1 + $0x140] sm:$0xff]  }
   0xb   :  { %1014 = vmatpush3.bf16.msra.mxu0 %v1145_v9  ;;  %v1162_v26 = vld [vmem:[%s1519_s1 + $0xf0] sm:$0xff]   ;;  %v1166_v30 = vld [vmem:[%s1519_s1 + $0xf8] sm:$0xff]   ;;  %v1172_v35 = vld [vmem:[%s1520_s0 + $0x8] ss:$28 sps:$4 sm:$0xff]  }
   0xc   :  { %1015 = vmatprep.subr.bf16.mxu0 %v1148_v12  ;;  %v1163_v27 = vld [vmem:[%s1519_s1 + $0xb0] sm:$0xff]   ;;  %v1167_v31 = vld [vmem:[%s1520_s0] ss:$28 sps:$4 sm:$0xff]   ;;  %v1174_v36 = vld [vmem:[%s1520_s0 + $0xc] ss:$28 sps:$4 sm:$0xff]  }
   0xd   :  { %1036 = vmatpush3.bf16.msra.mxu1 %v1147_v11  ;;  %v1170_v33 = vld [vmem:[%s1519_s1 + $0xb8] sm:$0xff]   ;;  %v1175_v37 = vld [vmem:[%s1519_s1 + $0x100] sm:$0xff]   ;;  %552 = vmatprep.mubr.bf16.mxu1 %v1174_v36  ;;  %v1176_v39 = vld [vmem:[%s1519_s1 + $0x148] sm:$0xff]  }
   0xe   :  { %1037 = vmatprep.subr.bf16.mxu1 %v1150_v14  ;;  %v1177_v40 = vld [vmem:[%s1519_s1 + $0x108] sm:$0xff]   ;;  %v1178_v41 = vld [vmem:[%s1519_s1 + $0x150] sm:$0xff]   ;;  %v1180_v43 = vld [vmem:[%s1519_s1 + $0x158] sm:$0xff]  }
   0xf   :  { %1016 = vmatpush3.bf16.msra.mxu0 %v1149_v13  ;;  %v1179_v42 = vld [vmem:[%s1519_s1 + $0x110] sm:$0xff]   ;;  %v1181_v44 = vld [vmem:[%s1519_s1 + $0x118] sm:$0xff]   ;;  %v1182_v45 = vld [vmem:[%s1519_s1 + $0x160] sm:$0xff]  }
  0x10   :  { %1017 = vmatprep.subr.bf16.mxu0 %v1152_v16  ;;  %v1183_v46 = vld [vmem:[%s1519_s1 + $0x120] sm:$0xff]   ;;  %v1184_v47 = vld [vmem:[%s1519_s1 + $0x168] sm:$0xff]   ;;  %v1193_v49 = vld [vmem:[%s1520_s0 + $0x14] ss:$28 sps:$4 sm:$0xff]  }
  0x11   :  { %1038 = vmatpush3.bf16.msra.mxu1 %v1151_v15  ;;  %v1190_v48 = vld [vmem:[%s1519_s1 + $0x180] sm:$0xff]   ;;  %v1194_v50 = vld [vmem:[%s1520_s0 + $0x18] ss:$28 sps:$4 sm:$0xff]   ;;  %v1185_v51 = vld [vmem:[%s1519_s1 + $0x128] sm:$0xff]  }
  0x12   :  { %1039 = vmatprep.subr.bf16.mxu1 %v1154_v18  ;;  %v1186_v52 = vld [vmem:[%s1519_s1 + $0x170] sm:$0xff]   ;;  %v1188_v54 = vld [vmem:[%s1519_s1 + $0x178] sm:$0xff]   ;;  %v1195_v57 = vld [vmem:[%s1521_s3] sm:$0xff]  }
  0x13   :  { %1018 = vmatpush3.bf16.msra.mxu0 %v1153_v17  ;;  %v1187_v53 = vld [vmem:[%s1519_s1 + $0x130] sm:$0xff]   ;;  %v1189_v55 = vld [vmem:[%s1519_s1 + $0x138] sm:$0xff]   ;;  %v1196_v58 = vld [vmem:[%s1521_s3 + $0x8] sm:$0xff]  }
  0x14   :  { %1019 = vmatprep.subr.bf16.mxu0 %v1156_v20  ;;  %v1191_v56 = vld [vmem:[%s1520_s0 + $0x10] ss:$28 sps:$4 sm:$0xff]   ;;  %v1198_v60 = vld [vmem:[%s1521_s3 + $0x18] sm:$0xff]   ;;  %v933_v62 = vld [vmem:[%s1523_s2] ss:$0 sm:$0xff] }
  0x15   :  { %1040 = vmatpush3.bf16.msra.mxu1 %v1155_v19  ;;  %v1197_v59 = vld [vmem:[%s1521_s3 + $0x10] sm:$0xff]   ;;  %v1200_v32 = vld [vmem:[%s1522_s5 + $0x8] sm:$0xff]  }
  0x16   :  { %1041 = vmatprep.subr.bf16.mxu1 %v1158_v22  ;;  %v1204_v36 = vld [vmem:[%s1524_s7 + $0x8] sm:$0xff]  }
  0x17   :  { %1020 = vmatpush3.bf16.msra.mxu0 %v1157_v21 }
  0x18   :  { %1021 = vmatprep.subr.bf16.mxu0 %v1160_v24 }
  0x19   :  { %1042 = vmatpush3.bf16.msra.mxu1 %v1159_v23 }
  0x1a   :  { %1043 = vmatprep.subr.bf16.mxu1 %v1162_v26 }
  0x1b   :  { %1022 = vmatpush3.bf16.msra.mxu0 %v1161_v25 }
  0x1c   :  { %1023 = vmatprep.subr.bf16.mxu0 %v1164_v28 }
  0x1d   :  { %1044 = vmatpush3.bf16.msra.mxu1 %v1163_v27 }
  0x1e   :  { %1045 = vmatprep.subr.bf16.mxu1 %v1166_v30  ;;  %v1199_v30 = vld [vmem:[%s1522_s5] sm:$0xff]  }
  0x1f   :  { %1024 = vmatpush3.bf16.msra.mxu0 %v1165_v29 }
  0x20   :  { %1053 = vmatprep.subr.bf16.mxu0 %v1171_v34  ;;  %v1202_v34 = vld [vmem:[%s1522_s5 + $0x18] sm:$0xff]  }
  0x21   :  { %1046 = vmatpush3.bf16.msra.mxu1 %v1170_v33  ;;  %v1201_v33 = vld [vmem:[%s1522_s5 + $0x10] sm:$0xff]  }
  0x22   :  { %512 = vmatmul.mubr.bf16.vlgmr.msra.gmra.mrb[0].mxu0 %v1167_v31  ;;  %1092 = vmatprep.subr.bf16.mxu1 %v1215_v38 }
  0x23   :  { %1054 = vmatpush3.bf16.msra.mxu0 %v1175_v37  ;;  %593 = vmatprep.mubr.bf16.mxu0 %v1193_v49  ;;  %v991_v37 = vld [vmem:[%s1525_s4] ss:$0 sm:$0xff]  ;;  %v1206_v49 = vld [vmem:[%s1524_s7 + $0x18] sm:$0xff]  }
  0x24   :  { %553 = vmatmul.mubr.bf16.vlgmr.msra.gmra.mrb[0].mxu1 %v1172_v35  ;;  %1055 = vmatprep.subr.bf16.mxu0 %v1176_v39  ;;  %v1203_v35 = vld [vmem:[%s1524_s7] sm:$0xff]  }
  0x25   :  { %1094 = vmatprep.mubr.msk.bf16.mxu1 %vm1216_vm0, %v1215_v38  ;;  %1093 = vmatpush3.bf16.msra.mxu1 %v1190_v48  ;;  %v1205_v48 = vld [vmem:[%s1524_s7 + $0x10] sm:$0xff]  }
  0x26   :  { %1098 = vmatprep.subr.bf16.mxu1 %v1215_v38 }
  0x27   :  { %1056 = vmatpush3.bf16.msra.mxu0 %v1177_v40 }
  0x28   :  { %1057 = vmatprep.subr.bf16.mxu0 %v1178_v41 }
  0x2b   :  { %1058 = vmatpush3.bf16.msra.mxu0 %v1179_v42 }
  0x2c   :  { %1059 = vmatprep.subr.bf16.mxu0 %v1180_v43  ;;  %1095 = vmatmul.mubr.msk.bf16.vlgmr.msra.gmra.mrb[4].mxu1 %vm475_vm1, %v1194_v50  ;;  %v997_v50 = vld [vmem:[%s1526_s6] ss:$0 sm:$0xff] }
  0x2d   :  { %1106 = vmatprep.mubr.msk.bf16.mxu1 %vm1216_vm0, %v1215_v38  ;;  %1099 = vmatpush3.bf16.msra.mxu1 %v1195_v57 }
  0x2e   :  { %1100 = vmatprep.subr.bf16.mxu1 %v1215_v38 }
  0x2f   :  { %1060 = vmatpush3.bf16.msra.mxu0 %v1181_v44 }
  0x30   :  { %1061 = vmatprep.subr.bf16.mxu0 %v1182_v45 }
  0x31   :  { %1101 = vmatpush3.bf16.msra.mxu1 %v1196_v58 }
  0x32   :  { %1102 = vmatprep.subr.bf16.mxu1 %v1215_v38 }
  0x33   :  { %1062 = vmatpush3.bf16.msra.mxu0 %v1183_v46 }
  0x34   :  { %1063 = vmatprep.subr.bf16.mxu0 %v1184_v47 }
  0x35   :  { %1103 = vmatpush3.bf16.msra.mxu1 %v1197_v59 }
  0x36   :  { %1104 = vmatprep.subr.bf16.mxu1 %v1215_v38 }
  0x37   :  { %1064 = vmatpush3.bf16.msra.mxu0 %v1185_v51 }
  0x38   :  { %1065 = vmatprep.subr.bf16.mxu0 %v1186_v52 }
  0x39   :  { %1105 = vmatpush3.bf16.msra.mxu1 %v1198_v60 }
  0x3a   :  { %1110 = vmatprep.subr.bf16.mxu1 %v1215_v38 }
  0x3b   :  { %1066 = vmatpush3.bf16.msra.mxu0 %v1187_v53 }
  0x3c   :  { %1067 = vmatprep.subr.bf16.mxu0 %v1188_v54 }
  0x3f   :  { %1068 = vmatpush3.bf16.msra.mxu0 %v1189_v55 }
  0x40   :  { %1122 = vmatprep.subr.bf16.mxu0 %v1215_v38 }
  0x42   :  { %594 = vmatmul.mubr.bf16.vlgmr.msra.gmra.mrb[4].mxu0 %v1191_v56 }
  0x43   :  { %1130 = vmatprep.mubr.msk.bf16.mxu0 %vm1216_vm0, %v1215_v38  ;;  %1123 = vmatpush3.bf16.msra.mxu0 %v1203_v35 }
  0x44   :  { %1124 = vmatprep.subr.bf16.mxu0 %v1215_v38 }
  0x47   :  { %1125 = vmatpush3.bf16.msra.mxu0 %v1204_v36 }
  0x48   :  { %1126 = vmatprep.subr.bf16.mxu0 %v1215_v38 }
  0x4b   :  { %1127 = vmatpush3.bf16.msra.mxu0 %v1205_v48 }
  0x4c   :  { %1128 = vmatprep.subr.bf16.mxu0 %v1215_v38 }
  0x4f   :  { %1129 = vmatpush3.bf16.msra.mxu0 %v1206_v49 }
  0xf5   :  { %v1025_v61 = vpop.f32.mrb[0].mxu0 }
  0xf6   :  { %v1026_v63 = vpop.f32.mrb[1].mxu0 }
  0xf7   :  { %v1027_v0 = vadd.f32 %v1026_v63, %v1025_v61  ;;  %v1028_v1 = vpop.f32.mrb[2].mxu0  ;;  %v1047_v2 = vpop.f32.mrb[0].mxu1 }
  0xf8   :  { %v1029_v3 = vpop.f32.mrb[3].mxu0  ;;  %v1048_v6 = vpop.f32.mrb[1].mxu1 }
  0xf9   :  { %v514_v4 = vadd.f32 %v1027_v0, %v933_v62  ;;  %v1030_v5 = vadd.f32 %v1029_v3, %v1028_v1  ;;  %v1049_v7 = vadd.f32 %v1048_v6, %v1047_v2  ;;  %v1050_v8 = vpop.f32.mrb[2].mxu1 }
  0xfa   :  { %v1051_v10 = vpop.f32.mrb[3].mxu1 }
  0xfb   :  { %v517_v9 = vadd.f32 %v1030_v5, %v933_v62  ;;  %v555_v11 = vadd.f32 %v1049_v7, %v514_v4  ;;  %v1052_v12 = vadd.f32 %v1051_v10, %v1050_v8 }
  0xfd   :  { %v558_v13 = vadd.f32 %v1052_v12, %v517_v9 }
  0xff   :  { %v636_v14 = vpop.f32.mrb[4].mxu1 }
 0x100   :  { %v1096_v15 = vpop.f32.mrb[5].mxu1 }
 0x101   :  { %v639_v16 = vpop.f32.mrb[6].mxu1 }
 0x102   :  { %v1097_v17 = vpop.f32.mrb[7].mxu1 }
 0x115   :  { %v1069_v18 = vpop.f32.mrb[4].mxu0 }
 0x116   :  { %v1070_v19 = vpop.f32.mrb[5].mxu0 }
 0x117   :  { %v1071_v20 = vadd.f32 %v1070_v19, %v1069_v18  ;;  %v1072_v21 = vpop.f32.mrb[6].mxu0 }
 0x118   :  { %v1073_v22 = vpop.f32.mrb[7].mxu0 }
 0x119   :  { %v596_v23 = vadd.f32 %v1071_v20, %v555_v11  ;;  %v1074_v24 = vadd.f32 %v1073_v22, %v1072_v21 }
 0x11b   :  { %v637_v25 = vadd.f32 %v636_v14, %v596_v23  ;;  %v599_v26 = vadd.f32 %v1074_v24, %v558_v13 }
 0x11d   :  { %v640_v27 = vadd.f32 %v639_v16, %v599_v26  ;;  %v643_v28 = vmax.f32 %v637_v25, 0.0 }
 0x11f   :  { %v644_v29 = vmax.f32 %v640_v27, 0.0 }
 0x121   :  { %v645_v31 = vpack.c.bf16 %v644_v29, %v643_v28 }
 0x123   :  { %1107 = vmatmul.mubr.msk.bf16.vlgmr.msra.gmra.mrb[8].mxu1 %vm685_vm2, %v645_v31 }
 0x124   :  { %1111 = vmatpush3.bf16.msra.mxu1 %v1199_v30  ;;  %1118 = vmatprep.mubr.msk.bf16.mxu1 %vm1216_vm0, %v1215_v38 }
 0x125   :  { %1112 = vmatprep.subr.bf16.mxu1 %v1215_v38 }
 0x128   :  { %1113 = vmatpush3.bf16.msra.mxu1 %v1200_v32 }
 0x129   :  { %1114 = vmatprep.subr.bf16.mxu1 %v1215_v38 }
 0x12c   :  { %1115 = vmatpush3.bf16.msra.mxu1 %v1201_v33 }
 0x12d   :  { %1116 = vmatprep.subr.bf16.mxu1 %v1215_v38  ;;  %v1003_v38 = vld [vmem:[%s1527_s8] ss:$0 sm:$0xff] }
 0x130   :  { %1117 = vmatpush3.bf16.msra.mxu1 %v1202_v34 }
 0x1f6   :  { %v723_v39 = vpop.f32.mrb[8].mxu1 }
 0x1f7   :  { %v724_v40 = vadd.f32 %v991_v37, %v723_v39  ;;  %v1108_v41 = vpop.f32.mrb[9].mxu1 }
 0x1f8   :  { %v726_v42 = vpop.f32.mrb[10].mxu1 }
 0x1f9   :  { %v727_v43 = vadd.f32 %v991_v37, %v726_v42  ;;  %v1109_v44 = vpop.f32.mrb[11].mxu1  ;;  %v730_v45 = vmax.f32 %v724_v40, 0.0 }
 0x1fb   :  { %v731_v46 = vmax.f32 %v727_v43, 0.0 }
 0x1fd   :  { %v732_v47 = vpack.c.bf16 %v731_v46, %v730_v45 }
 0x1ff   :  { %1119 = vmatmul.mubr.msk.bf16.vlgmr.msra.gmra.mrb[12].mxu1 %vm685_vm2, %v732_v47 }
 0x2d2   :  { %v809_v51 = vpop.f32.mrb[12].mxu1 }
 0x2d3   :  { %v810_v52 = vadd.f32 %v997_v50, %v809_v51  ;;  %v1120_v53 = vpop.f32.mrb[13].mxu1 }
 0x2d4   :  { %v812_v54 = vpop.f32.mrb[14].mxu1 }
 0x2d5   :  { %v813_v55 = vadd.f32 %v997_v50, %v812_v54  ;;  %v1121_v56 = vpop.f32.mrb[15].mxu1  ;;  %v816_v57 = vmax.f32 %v810_v52, 0.0 }
 0x2d7   :  { %v817_v58 = vmax.f32 %v813_v55, 0.0 }
 0x2d9   :  { %v818_v59 = vpack.c.bf16 %v817_v58, %v816_v57 }
 0x2db   :  { %1131 = vmatmul.mubr.msk.bf16.vlgmr.msra.gmra.mrb[8].mxu0 %vm685_vm2, %v818_v59 }
 0x3ae   :  { %v895_v60 = vpop.f32.mrb[8].mxu0 }
 0x3af   :  { %v896_v61 = vadd.f32 %v1003_v38, %v895_v60  ;;  %v1132_v62 = vpop.f32.mrb[9].mxu0 }
 0x3b0   :  { %v898_v63 = vpop.f32.mrb[10].mxu0 }
 0x3b1   :  { %v899_v0 = vadd.f32 %v1003_v38, %v898_v63  ;;  %v1133_v1 = vpop.f32.mrb[11].mxu0  ;;  %v903_v2 = vsel %vm902_vm3, %v896_v61, -inf }
 0x3b2   :  { %904 = vmax.xlane.f32.xlu0 %v903_v2 }
 0x3b3   :  { %v906_v3 = vsel %vm902_vm3, %v899_v0, -inf }
 0x3b6   :  { %907 = vmax.xlane.f32.xlu0 %v906_v3 }
 0x43f   :  { %v905_v4 = vpop.xlane.xlu0 %904 }
 0x440   :  { %v909_v5 = vsub.f32 %v896_v61, %v905_v4 }
 0x442   :  { %v911_v6 = vmul.f32 1.442695, %v909_v5 }
 0x443   :  { %v908_v7 = vpop.xlane.xlu0 %907 }
 0x444   :  { %1207 = vpow2.f32 %v911_v6  ;;  %v910_v8 = vsub.f32 %v899_v0, %v908_v7 }
 0x446   :  { %v913_v9 = vmul.f32 1.442695, %v910_v8 }
 0x448   :  { %1209 = vpow2.f32 %v913_v9 }
 0x44e   :  { %v1208_v10 = vpop.eup %1207 }
 0x44f   :  { %v915_v11 = vsel %vm902_vm3, %v1208_v10, 0.0 }
 0x450   :  { %916 = vadd.xlane.f32.xlu1 %v915_v11 }
 0x452   :  { %v1210_v12 = vpop.eup %1209 }
 0x453   :  { %v918_v13 = vsel %vm902_vm3, %v1210_v12, 0.0 }
 0x454   :  { %919 = vadd.xlane.f32.xlu1 %v918_v13 }
 0x4dd   :  { %v917_v14 = vpop.xlane.xlu1 %916 }
 0x4de   :  { %1211 = vlog2.f32 %v917_v14 }
 0x4e1   :  { %v920_v15 = vpop.xlane.xlu1 %919 }
 0x4e2   :  { %1213 = vlog2.f32 %v920_v15 }
 0x4e8   :  { %v1212_v16 = vpop.eup %1211 }
 0x4e9   :  { %v922_v17 = vmul.f32 0.6931472, %v1212_v16 }
 0x4eb   :  { %v925_v18 = vsub.f32 %v909_v5, %v922_v17 }
 0x4ec   :  { %v1214_v19 = vpop.eup %1213 }
 0x4ed   :  { %927 = vst.msk [vmem:[%s1528_s9] sm:$0xff] %vm902_vm3, %v925_v18  ;;  %v924_v20 = vmul.f32 0.6931472, %v1214_v19 }
 0x4ef   :  { %v926_v21 = vsub.f32 %v910_v8, %v924_v20 }
 0x4f1   :  { %928 = vst.msk [vmem:[%s1528_s9 + $0x8] sm:$0xff] %vm902_vm3, %v926_v21 }

</bundles_post_ra>
